<compile_context>
chip_gen: v7x
topology: tpu7x:2x2x1
jax: 0.10.0
libtpu: 0.0.40
codegen_flags: <defaults>
</compile_context>

<pallas_src>
import functools

import jax
import jax.numpy as jnp
from jax.experimental import pallas as pl
from jax.experimental.pallas import tpu as pltpu

TAU_INV = 0.5  # 1 / tau, tau = 2.0


def _lif_step(v_mem, x, threshold):
    h = v_mem + (x - v_mem) * TAU_INV
    spike = (h >= threshold).astype(jnp.float32)
    v_new = h * (1.0 - spike)
    return spike, v_new


def ms_ssa_kernel(x_ref, wqkv_ref, bqkv_ref, wp_ref, bp_ref,
                  out_ref, vout_ref,
                  vs_mem, vqkv_mem, vkv_mem):
    # grid = (B // block_b, T).  T is the inner, sequentially-executed
    # ("arbitrary") axis so the LIF membrane state carried in VMEM scratch is
    # stepped in time order and reset at t == 0 for each batch block / core.
    t = pl.program_id(1)

    block_b, C, N = x_ref.shape

    @pl.when(t == 0)
    def _():
        vs_mem[...] = jnp.zeros_like(vs_mem)
        vqkv_mem[...] = jnp.zeros_like(vqkv_mem)
        vkv_mem[...] = jnp.zeros_like(vkv_mem)

    # Weights / biases are constant-indexed (DMA'd once by the pipeline);
    # hoist the loads out of the per-image loop.
    wqkv = wqkv_ref[...]            # (3C, C)  bf16
    bqkv = bqkv_ref[...]            # (3C, 1)  f32
    wp = wp_ref[...]                # (C, C)   bf16
    bp = bp_ref[...]                # (C, 1)   f32

    # shortcut LIF, vectorized over the whole batch block (pure VPU work).
    x_all = x_ref[...]                                   # (bb, C, N) == identity
    xs_all, vs_new = _lif_step(vs_mem[...], x_all, 1.0)
    vs_mem[...] = vs_new
    xs_bf16 = xs_all.astype(jnp.bfloat16)                # binary spikes, exact in bf16

    for b in range(block_b):        # static, small (capped); per-image 2D matmuls
        # fused Q/K/V: one (3C, C) @ (C, N) bf16 matmul (+ folded BN bias),
        # then one LIF over all 3C channels (q/k/v thresholds are all 1.0).
        qkv_pre = jnp.dot(wqkv, xs_bf16[b],
                          preferred_element_type=jnp.float32) + bqkv
        qkv_spk, vqkv_new = _lif_step(vqkv_mem[b], qkv_pre, 1.0)
        vqkv_mem[b] = vqkv_new

        q_spk = qkv_spk[:C]         # sublane-aligned slices (C multiple of 8)
        k_spk = qkv_spk[C:2 * C]
        v_spk = qkv_spk[2 * C:]

        # kv = sum over N of (k * v), per channel (== per (head, head_dim));
        # cross-lane reduce goes to the XLU (free slot vs the VPU/MXU work).
        kv_sum = jnp.sum(k_spk * v_spk, axis=1, keepdims=True)      # (C, 1)
        kv_spk, vkv_new = _lif_step(vkv_mem[b], kv_sum, 0.5)        # talking_heads_lif
        vkv_mem[b] = vkv_new

        # attention: q * kv, broadcast over the N (lane) axis; still binary.
        attn = q_spk * kv_spk                                       # (C, N)

        # proj 1x1 conv (with bias) + folded BN, then residual with identity
        out = jnp.dot(wp, attn.astype(jnp.bfloat16),
                      preferred_element_type=jnp.float32) + bp
        out_ref[b] = out + x_all[b]
        vout_ref[b] = v_spk.astype(jnp.bfloat16)


def fold_bn(w, conv_bias, gamma, beta, mean, var, eps=1e-5):
    """Fold inference-mode BatchNorm2d into a 1x1 conv.

    w: (C_out, C_in).  Returns (W, b) with W (C_out, C_in) f32 and b (C_out, 1)
    f32 such that  y = W @ x + b  matches  BN(conv(x))  for x of shape (C_in, N).
    """
    scale = gamma / jnp.sqrt(var + eps)                 # (C_out,)
    w_f = w * scale[:, None]
    if conv_bias is None:
        b_f = beta - scale * mean
    else:
        b_f = scale * (conv_bias - mean) + beta
    return jnp.asarray(w_f, jnp.float32), jnp.asarray(b_f[:, None], jnp.float32)


def _prep_weights(params):
    """Concatenate q/k/v folded weights into one (3C, C) bf16 matrix (+ bias)."""
    wq, bq = params["q"]
    wk, bk = params["k"]
    wv, bv = params["v"]
    wp, bp = params["p"]
    wqkv = jnp.concatenate([wq, wk, wv], axis=0).astype(jnp.bfloat16)   # (3C, C)
    bqkv = jnp.concatenate([bq, bk, bv], axis=0)                        # (3C, 1) f32
    return wqkv, bqkv, wp.astype(jnp.bfloat16), bp


def _pick_block_b(B, C, N):
    """Batch elements per block.  Bigger blocks amortize the ~0.35us/step grid
    overhead, but (a) keep >=2 blocks on the parallel axis when B allows so
    both v7x TensorCores get work, (b) keep the per-block VMEM footprint
    (double-buffered I/O blocks + the membrane scratch, roughly 40*C*N bytes
    per image) well under the default scoped VMEM limit, and (c) cap the
    statically-unrolled per-image matmul loop."""
    block_b = B if B < 2 else B // 2
    block_b = min(block_b, 8)                 # bound unrolled code size
    budget = 8 << 20
    per_image = 40 * C * N
    while block_b > 1 and block_b * per_image > budget:
        block_b -= 1
    while block_b > 1 and B % block_b != 0:
        block_b -= 1
    return max(block_b, 1)


def ms_ssa_conv(x_tbchw, params, num_heads, block_b=None):
    """Pallas implementation of MS_SSA_Conv.forward (dvs=False, spike_mode='lif')."""
    T, B, C, H, W = x_tbchw.shape
    N = H * W
    # Free (contiguous) reshape -- no HBM transpose pass; kernel uses native layout.
    x = x_tbchw.reshape(T, B, C, N).astype(jnp.float32)

    wqkv, bqkv, wp, bp = _prep_weights(params)

    if block_b is None:
        block_b = _pick_block_b(B, C, N)
    assert B % block_b == 0
    nb = B // block_b

    spec_x = pl.BlockSpec((None, block_b, C, N), lambda b, t: (t, b, 0, 0))
    # Constant index_map -> the pipeline only fetches these once.
    spec_wqkv = pl.BlockSpec((3 * C, C), lambda b, t: (0, 0))
    spec_bqkv = pl.BlockSpec((3 * C, 1), lambda b, t: (0, 0))
    spec_wp = pl.BlockSpec((C, C), lambda b, t: (0, 0))
    spec_bp = pl.BlockSpec((C, 1), lambda b, t: (0, 0))

    out_nat, v_nat = pl.pallas_call(
        ms_ssa_kernel,
        out_shape=(jax.ShapeDtypeStruct((T, B, C, N), jnp.float32),
                   jax.ShapeDtypeStruct((T, B, C, N), jnp.bfloat16)),
        grid_spec=pltpu.PrefetchScalarGridSpec(
            num_scalar_prefetch=0,
            grid=(nb, T),
            in_specs=[spec_x, spec_wqkv, spec_bqkv, spec_wp, spec_bp],
            out_specs=[spec_x, spec_x],
            scratch_shapes=[pltpu.VMEM((block_b, C, N), jnp.float32),       # shortcut_lif V
                            pltpu.VMEM((block_b, 3 * C, N), jnp.float32),   # fused q/k/v lif V
                            pltpu.VMEM((block_b, C, 1), jnp.float32)]),     # talking_heads_lif V
        compiler_params=pltpu.CompilerParams(
            dimension_semantics=("parallel", "arbitrary")),
    )(x, wqkv, bqkv, wp, bp)

    x_out = out_nat.reshape(T, B, C, H, W)                       # free reshape
    head_dim = C // num_heads
    # (T,B,C,N) -> (T,B,heads,head_dim,N) -> (T,B,heads,N,head_dim); bf16 spikes.
    v_out = v_nat.reshape(T, B, num_heads, head_dim, N).transpose(0, 1, 2, 4, 3)
    return x_out, v_out


# -------------------- pure-JAX reference (for verification) --------------------
def _lif_scan(x_seq, threshold):
    def step(v, x):
        h = v + (x - v) * TAU_INV
        s = (h >= threshold).astype(jnp.float32)
        return h * (1.0 - s), s
    _, spikes = jax.lax.scan(step, jnp.zeros_like(x_seq[0]), x_seq)
    return spikes


def ms_ssa_conv_ref(x_tbchw, params, num_heads):
    T, B, C, H, W = x_tbchw.shape
    N = H * W
    x = x_tbchw.reshape(T, B, C, N).astype(jnp.float32)
    wqkv, bqkv, wp, bp = _prep_weights(params)   # same bf16 weights as the kernel

    xs = _lif_scan(x, 1.0)
    qkv_pre = jnp.einsum("oc,tbcn->tbon", wqkv, xs.astype(jnp.bfloat16),
                         preferred_element_type=jnp.float32) + bqkv
    qkv = _lif_scan(qkv_pre, 1.0)
    q, k, v = qkv[:, :, :C], qkv[:, :, C:2 * C], qkv[:, :, 2 * C:]
    kv = _lif_scan(jnp.sum(k * v, axis=-1, keepdims=True), 0.5)
    attn = q * kv
    out = jnp.einsum("oc,tbcn->tbon", wp, attn.astype(jnp.bfloat16),
                     preferred_element_type=jnp.float32) + bp + x
    x_out = out.reshape(T, B, C, H, W)
    head_dim = C // num_heads
    v_out = v.reshape(T, B, num_heads, head_dim, N).transpose(0, 1, 2, 4, 3)
    return x_out, v_out


def make_params(key, dim):
    """Deterministic synthetic parameters (conv weights + folded BN stats)."""
    ks = jax.random.split(key, 16)
    params = {}
    for i, name in enumerate(["q", "k", "v", "p"]):
        w = jax.random.normal(ks[4 * i + 0], (dim, dim), jnp.float32) * (1.5 / jnp.sqrt(dim))
        gamma = 1.0 + 0.1 * jax.random.normal(ks[4 * i + 1], (dim,), jnp.float32)
        beta = 0.1 * jax.random.normal(ks[4 * i + 2], (dim,), jnp.float32)
        mean = 0.05 * jax.random.normal(ks[4 * i + 3], (dim,), jnp.float32)
        var = 1.0 + 0.1 * jnp.abs(jax.random.normal(ks[4 * i + 3], (dim,), jnp.float32))
        conv_bias = None
        if name == "p":  # proj_conv has a bias (default Conv2d)
            conv_bias = 0.1 * jax.random.normal(ks[4 * i + 2], (dim,), jnp.float32)
        params[name] = fold_bn(w, conv_bias, gamma, beta, mean, var)
    return params


# TODO(synk): dvs=True path (Erode / MaxPool3d over 3x3 neighborhoods) is not
# implemented; the module's default forward (dvs=False) never calls it.

if __name__ == "__main__":
    T, B, C, H, W = 4, 2, 32, 8, 8
    num_heads = 8

    key = jax.random.PRNGKey(0)
    kx, kp = jax.random.split(key)
    x = jax.random.uniform(kx, (T, B, C, H, W), jnp.float32, minval=0.0, maxval=3.0)
    params = make_params(kp, C)

    run = jax.jit(functools.partial(ms_ssa_conv, num_heads=num_heads))
    x_out, v_out = run(x, params)
    jax.block_until_ready((x_out, v_out))

    x_ref, v_ref = ms_ssa_conv_ref(x, params, num_heads)
    assert x_out.shape == (T, B, C, H, W)
    assert v_out.shape == (T, B, num_heads, H * W, C // num_heads)
    assert jnp.allclose(x_out, x_ref, atol=2e-3, rtol=1e-3), "x mismatch vs reference"
    assert jnp.allclose(v_out.astype(jnp.float32), v_ref, atol=1e-3), "v mismatch vs reference"

    print("KERNEL_OK")
</pallas_src>

<mosaic_0001>
module attributes {stable_mosaic.version = 11 : i64} {
  func.func @ms_ssa_kernel(%arg0: i32, %arg1: i32, %arg2: memref<1x1x32x64xf32, #tpu.memory_space<vmem>>, %arg3: memref<96x32xbf16, #tpu.memory_space<vmem>>, %arg4: memref<96x1xf32, #tpu.memory_space<vmem>>, %arg5: memref<32x32xbf16, #tpu.memory_space<vmem>>, %arg6: memref<32x1xf32, #tpu.memory_space<vmem>>, %arg7: memref<1x1x32x64xf32, #tpu.memory_space<vmem>>, %arg8: memref<1x1x32x64xbf16, #tpu.memory_space<vmem>>, %arg9: memref<1x32x64xf32, #tpu.memory_space<vmem>>, %arg10: memref<1x96x64xf32, #tpu.memory_space<vmem>>, %arg11: memref<1x32x1xf32, #tpu.memory_space<vmem>>) attributes {dimension_semantics = [#tpu.dimension_semantics<parallel>, #tpu.dimension_semantics<arbitrary>], iteration_bounds = array<i64: 2, 4>, scalar_prefetch = 0 : i64, scratch_operands = 3 : i64, tpu.core_type = #tpu.core_type<tc>, window_params = [{transform_indices = @transform_0, window_bounds = array<i64: 1, 1, 32, 64>}, {pipeline_mode = #tpu.pipeline_mode<synchronous>, transform_indices = @transform_1, window_bounds = array<i64: 96, 32>}, {pipeline_mode = #tpu.pipeline_mode<synchronous>, transform_indices = @transform_2, window_bounds = array<i64: 96, 1>}, {pipeline_mode = #tpu.pipeline_mode<synchronous>, transform_indices = @transform_3, window_bounds = array<i64: 32, 32>}, {pipeline_mode = #tpu.pipeline_mode<synchronous>, transform_indices = @transform_4, window_bounds = array<i64: 32, 1>}, {transform_indices = @transform_5, window_bounds = array<i64: 1, 1, 32, 64>}, {transform_indices = @transform_6, window_bounds = array<i64: 1, 1, 32, 64>}]} {
    %c0_i32 = arith.constant 0 : i32
    %0 = arith.cmpi eq, %arg1, %c0_i32 : i32
    %1 = arith.extui %0 : i1 to i32
    %c0_i32_0 = arith.constant 0 : i32
    %2 = arith.cmpi ne, %1, %c0_i32_0 : i32
    scf.if %2 {
      %cst_49 = arith.constant 0.000000e+00 : f32
      %80 = vector.broadcast %cst_49 : f32 to vector<1x32x64xf32>
      %c0_50 = arith.constant 0 : index
      %c0_51 = arith.constant 0 : index
      %c0_52 = arith.constant 0 : index
      %81 = vector.load %arg9[%c0_50, %c0_51, %c0_52] : memref<1x32x64xf32, #tpu.memory_space<vmem>>, vector<1x32x64xf32>
      tpu.vector_store %arg9[%c0_50, %c0_51, %c0_52], %80 {strides = array<i32>} : memref<1x32x64xf32, #tpu.memory_space<vmem>>, vector<1x32x64xf32>,
      %cst_53 = arith.constant 0.000000e+00 : f32
      %82 = vector.broadcast %cst_53 : f32 to vector<1x96x64xf32>
      %c0_54 = arith.constant 0 : index
      %c0_55 = arith.constant 0 : index
      %c0_56 = arith.constant 0 : index
      %83 = vector.load %arg10[%c0_54, %c0_55, %c0_56] : memref<1x96x64xf32, #tpu.memory_space<vmem>>, vector<1x96x64xf32>
      tpu.vector_store %arg10[%c0_54, %c0_55, %c0_56], %82 {strides = array<i32>} : memref<1x96x64xf32, #tpu.memory_space<vmem>>, vector<1x96x64xf32>,
      %cst_57 = arith.constant 0.000000e+00 : f32
      %84 = vector.broadcast %cst_57 : f32 to vector<1x32x1xf32>
      %c0_58 = arith.constant 0 : index
      %c0_59 = arith.constant 0 : index
      %c0_60 = arith.constant 0 : index
      %85 = vector.load %arg11[%c0_58, %c0_59, %c0_60] : memref<1x32x1xf32, #tpu.memory_space<vmem>>, vector<1x32x1xf32>
      tpu.vector_store %arg11[%c0_58, %c0_59, %c0_60], %84 {strides = array<i32>} : memref<1x32x1xf32, #tpu.memory_space<vmem>>, vector<1x32x1xf32>,
    } else {
    }
    %c0 = arith.constant 0 : index
    %c0_1 = arith.constant 0 : index
    %3 = vector.load %arg3[%c0, %c0_1] : memref<96x32xbf16, #tpu.memory_space<vmem>>, vector<96x32xbf16>
    %c0_2 = arith.constant 0 : index
    %c0_3 = arith.constant 0 : index
    %4 = vector.load %arg4[%c0_2, %c0_3] : memref<96x1xf32, #tpu.memory_space<vmem>>, vector<96x1xf32>
    %c0_4 = arith.constant 0 : index
    %c0_5 = arith.constant 0 : index
    %5 = vector.load %arg5[%c0_4, %c0_5] : memref<32x32xbf16, #tpu.memory_space<vmem>>, vector<32x32xbf16>
    %c0_6 = arith.constant 0 : index
    %c0_7 = arith.constant 0 : index
    %6 = vector.load %arg6[%c0_6, %c0_7] : memref<32x1xf32, #tpu.memory_space<vmem>>, vector<32x1xf32>
    %c0_8 = arith.constant 0 : index
    %c0_9 = arith.constant 0 : index
    %c0_10 = arith.constant 0 : index
    %c0_11 = arith.constant 0 : index
    %7 = vector.load %arg2[%c0_8, %c0_9, %c0_10, %c0_11] : memref<1x1x32x64xf32, #tpu.memory_space<vmem>>, vector<1x1x32x64xf32>
    %8 = vector.shape_cast %7 : vector<1x1x32x64xf32> to vector<1x32x64xf32>
    %c0_12 = arith.constant 0 : index
    %c0_13 = arith.constant 0 : index
    %c0_14 = arith.constant 0 : index
    %9 = vector.load %arg9[%c0_12, %c0_13, %c0_14] : memref<1x32x64xf32, #tpu.memory_space<vmem>>, vector<1x32x64xf32>
    %10 = arith.subf %8, %9 : vector<1x32x64xf32>
    %cst = arith.constant 5.000000e-01 : f32
    %11 = vector.broadcast %cst : f32 to vector<1x32x64xf32>
    %12 = arith.mulf %10, %11 : vector<1x32x64xf32>
    %13 = arith.addf %9, %12 : vector<1x32x64xf32>
    %cst_15 = arith.constant 1.000000e+00 : f32
    %14 = vector.broadcast %cst_15 : f32 to vector<1x32x64xf32>
    %15 = arith.cmpf oge, %13, %14 : vector<1x32x64xf32>
    %16 = arith.extui %15 : vector<1x32x64xi1> to vector<1x32x64xi32>
    %17 = arith.sitofp %16 : vector<1x32x64xi32> to vector<1x32x64xf32>
    %cst_16 = arith.constant 1.000000e+00 : f32
    %18 = vector.broadcast %cst_16 : f32 to vector<1x32x64xf32>
    %19 = arith.subf %18, %17 : vector<1x32x64xf32>
    %20 = arith.mulf %13, %19 : vector<1x32x64xf32>
    %c0_17 = arith.constant 0 : index
    %c0_18 = arith.constant 0 : index
    %c0_19 = arith.constant 0 : index
    %21 = vector.load %arg9[%c0_17, %c0_18, %c0_19] : memref<1x32x64xf32, #tpu.memory_space<vmem>>, vector<1x32x64xf32>
    tpu.vector_store %arg9[%c0_17, %c0_18, %c0_19], %20 {strides = array<i32>} : memref<1x32x64xf32, #tpu.memory_space<vmem>>, vector<1x32x64xf32>,
    %22 = arith.truncf %17 : vector<1x32x64xf32> to vector<1x32x64xbf16>
    %23 = vector.shape_cast %22 : vector<1x32x64xbf16> to vector<32x64xbf16>
    %cst_20 = arith.constant dense<0.000000e+00> : vector<96x64xf32>
    %24 = tpu.matmul %3, %23, %cst_20 {dimension_numbers = #tpu.dot_dimension_numbers<[1], [0], [0], [1], [0, 0, 1, 1], [], []>} : vector<96x32xbf16>, vector<32x64xbf16>, vector<96x64xf32> -> vector<96x64xf32>
    %25 = vector.broadcast %4 : vector<96x1xf32> to vector<96x64xf32>
    %26 = arith.addf %24, %25 : vector<96x64xf32>
    %c0_21 = arith.constant 0 : index
    %c0_22 = arith.constant 0 : index
    %c0_23 = arith.constant 0 : index
    %27 = vector.load %arg10[%c0_21, %c0_22, %c0_23] : memref<1x96x64xf32, #tpu.memory_space<vmem>>, vector<1x96x64xf32>
    %28 = vector.shape_cast %27 : vector<1x96x64xf32> to vector<96x64xf32>
    %29 = arith.subf %26, %28 : vector<96x64xf32>
    %cst_24 = arith.constant 5.000000e-01 : f32
    %30 = vector.broadcast %cst_24 : f32 to vector<96x64xf32>
    %31 = arith.mulf %29, %30 : vector<96x64xf32>
    %32 = arith.addf %28, %31 : vector<96x64xf32>
    %cst_25 = arith.constant 1.000000e+00 : f32
    %33 = vector.broadcast %cst_25 : f32 to vector<96x64xf32>
    %34 = arith.cmpf oge, %32, %33 : vector<96x64xf32>
    %35 = arith.extui %34 : vector<96x64xi1> to vector<96x64xi32>
    %36 = arith.sitofp %35 : vector<96x64xi32> to vector<96x64xf32>
    %cst_26 = arith.constant 1.000000e+00 : f32
    %37 = vector.broadcast %cst_26 : f32 to vector<96x64xf32>
    %38 = arith.subf %37, %36 : vector<96x64xf32>
    %39 = arith.mulf %32, %38 : vector<96x64xf32>
    %c0_27 = arith.constant 0 : index
    %c0_28 = arith.constant 0 : index
    %c0_29 = arith.constant 0 : index
    %40 = vector.load %arg10[%c0_27, %c0_28, %c0_29] : memref<1x96x64xf32, #tpu.memory_space<vmem>>, vector<1x96x64xf32>
    %41 = vector.shape_cast %40 : vector<1x96x64xf32> to vector<96x64xf32>
    %42 = vector.shape_cast %39 : vector<96x64xf32> to vector<1x96x64xf32>
    tpu.vector_store %arg10[%c0_27, %c0_28, %c0_29], %42 {strides = array<i32>} : memref<1x96x64xf32, #tpu.memory_space<vmem>>, vector<1x96x64xf32>,
    %43 = vector.extract_strided_slice %36 {offsets = [0, 0], sizes = [32, 64], strides = [1, 1]} : vector<96x64xf32> to vector<32x64xf32>
    %44 = vector.extract_strided_slice %36 {offsets = [32, 0], sizes = [32, 64], strides = [1, 1]} : vector<96x64xf32> to vector<32x64xf32>
    %45 = vector.extract_strided_slice %36 {offsets = [64, 0], sizes = [32, 64], strides = [1, 1]} : vector<96x64xf32> to vector<32x64xf32>
    %46 = arith.mulf %44, %45 : vector<32x64xf32>
    %cst_30 = arith.constant dense<0.000000e+00> : vector<32xf32>
    %47 = vector.multi_reduction <add>, %46, %cst_30 [1] : vector<32x64xf32> to vector<32xf32>
    %48 = vector.shape_cast %47 : vector<32xf32> to vector<32x1xf32>
    %c0_31 = arith.constant 0 : index
    %c0_32 = arith.constant 0 : index
    %c0_33 = arith.constant 0 : index
    %49 = vector.load %arg11[%c0_31, %c0_32, %c0_33] : memref<1x32x1xf32, #tpu.memory_space<vmem>>, vector<1x32x1xf32>
    %50 = vector.shape_cast %49 : vector<1x32x1xf32> to vector<32x1xf32>
    %51 = arith.subf %48, %50 : vector<32x1xf32>
    %cst_34 = arith.constant 5.000000e-01 : f32
    %52 = vector.broadcast %cst_34 : f32 to vector<32x1xf32>
    %53 = arith.mulf %51, %52 : vector<32x1xf32>
    %54 = arith.addf %50, %53 : vector<32x1xf32>
    %cst_35 = arith.constant 5.000000e-01 : f32
    %55 = vector.broadcast %cst_35 : f32 to vector<32x1xf32>
    %56 = arith.cmpf oge, %54, %55 : vector<32x1xf32>
    %57 = arith.extui %56 : vector<32x1xi1> to vector<32x1xi32>
    %58 = arith.sitofp %57 : vector<32x1xi32> to vector<32x1xf32>
    %cst_36 = arith.constant 1.000000e+00 : f32
    %59 = vector.broadcast %cst_36 : f32 to vector<32x1xf32>
    %60 = arith.subf %59, %58 : vector<32x1xf32>
    %61 = arith.mulf %54, %60 : vector<32x1xf32>
    %c0_37 = arith.constant 0 : index
    %c0_38 = arith.constant 0 : index
    %c0_39 = arith.constant 0 : index
    %62 = vector.load %arg11[%c0_37, %c0_38, %c0_39] : memref<1x32x1xf32, #tpu.memory_space<vmem>>, vector<1x32x1xf32>
    %63 = vector.shape_cast %62 : vector<1x32x1xf32> to vector<32x1xf32>
    %64 = vector.shape_cast %61 : vector<32x1xf32> to vector<1x32x1xf32>
    tpu.vector_store %arg11[%c0_37, %c0_38, %c0_39], %64 {strides = array<i32>} : memref<1x32x1xf32, #tpu.memory_space<vmem>>, vector<1x32x1xf32>,
    %65 = vector.broadcast %58 : vector<32x1xf32> to vector<32x64xf32>
    %66 = arith.mulf %43, %65 : vector<32x64xf32>
    %67 = arith.truncf %66 : vector<32x64xf32> to vector<32x64xbf16>
    %cst_40 = arith.constant dense<0.000000e+00> : vector<32x64xf32>
    %68 = tpu.matmul %5, %67, %cst_40 {dimension_numbers = #tpu.dot_dimension_numbers<[1], [0], [0], [1], [0, 0, 1, 1], [], []>} : vector<32x32xbf16>, vector<32x64xbf16>, vector<32x64xf32> -> vector<32x64xf32>
    %69 = vector.broadcast %6 : vector<32x1xf32> to vector<32x64xf32>
    %70 = arith.addf %68, %69 : vector<32x64xf32>
    %71 = vector.shape_cast %8 : vector<1x32x64xf32> to vector<32x64xf32>
    %72 = arith.addf %70, %71 : vector<32x64xf32>
    %c0_41 = arith.constant 0 : index
    %c0_42 = arith.constant 0 : index
    %c0_43 = arith.constant 0 : index
    %c0_44 = arith.constant 0 : index
    %73 = vector.load %arg7[%c0_41, %c0_42, %c0_43, %c0_44] : memref<1x1x32x64xf32, #tpu.memory_space<vmem>>, vector<1x1x32x64xf32>
    %74 = vector.shape_cast %73 : vector<1x1x32x64xf32> to vector<32x64xf32>
    %75 = vector.shape_cast %72 : vector<32x64xf32> to vector<1x1x32x64xf32>
    tpu.vector_store %arg7[%c0_41, %c0_42, %c0_43, %c0_44], %75 {strides = array<i32>} : memref<1x1x32x64xf32, #tpu.memory_space<vmem>>, vector<1x1x32x64xf32>,
    %76 = arith.truncf %45 : vector<32x64xf32> to vector<32x64xbf16>
    %c0_45 = arith.constant 0 : index
    %c0_46 = arith.constant 0 : index
    %c0_47 = arith.constant 0 : index
    %c0_48 = arith.constant 0 : index
    %77 = vector.load %arg8[%c0_45, %c0_46, %c0_47, %c0_48] : memref<1x1x32x64xbf16, #tpu.memory_space<vmem>>, vector<1x1x32x64xbf16>
    %78 = vector.shape_cast %77 : vector<1x1x32x64xbf16> to vector<32x64xbf16>
    %79 = vector.shape_cast %76 : vector<32x64xbf16> to vector<1x1x32x64xbf16>
    tpu.vector_store %arg8[%c0_45, %c0_46, %c0_47, %c0_48], %79 {strides = array<i32>} : memref<1x1x32x64xbf16, #tpu.memory_space<vmem>>, vector<1x1x32x64xbf16>,
    return
  }
  func.func @transform_0(%arg0: i32, %arg1: i32) -> (i32, i32, i32, i32) {
    %c0_i32 = arith.constant 0 : i32
    %c0_i32_0 = arith.constant 0 : i32
    %c0_i32_1 = arith.constant 0 : i32
    return %arg1, %arg0, %c0_i32, %c0_i32_0 : i32, i32, i32, i32
  }
  func.func @transform_1(%arg0: i32, %arg1: i32) -> (i32, i32) {
    %c0_i32 = arith.constant 0 : i32
    %c0_i32_0 = arith.constant 0 : i32
    %c0_i32_1 = arith.constant 0 : i32
    return %c0_i32, %c0_i32_0 : i32, i32
  }
  func.func @transform_2(%arg0: i32, %arg1: i32) -> (i32, i32) {
    %c0_i32 = arith.constant 0 : i32
    %c0_i32_0 = arith.constant 0 : i32
    %c0_i32_1 = arith.constant 0 : i32
    return %c0_i32, %c0_i32_0 : i32, i32
  }
  func.func @transform_3(%arg0: i32, %arg1: i32) -> (i32, i32) {
    %c0_i32 = arith.constant 0 : i32
    %c0_i32_0 = arith.constant 0 : i32
    %c0_i32_1 = arith.constant 0 : i32
    return %c0_i32, %c0_i32_0 : i32, i32
  }
  func.func @transform_4(%arg0: i32, %arg1: i32) -> (i32, i32) {
    %c0_i32 = arith.constant 0 : i32
    %c0_i32_0 = arith.constant 0 : i32
    %c0_i32_1 = arith.constant 0 : i32
    return %c0_i32, %c0_i32_0 : i32, i32
  }
  func.func @transform_5(%arg0: i32, %arg1: i32) -> (i32, i32, i32, i32) {
    %c0_i32 = arith.constant 0 : i32
    %c0_i32_0 = arith.constant 0 : i32
    %c0_i32_1 = arith.constant 0 : i32
    return %arg1, %arg0, %c0_i32, %c0_i32_0 : i32, i32, i32, i32
  }
  func.func @transform_6(%arg0: i32, %arg1: i32) -> (i32, i32, i32, i32) {
    %c0_i32 = arith.constant 0 : i32
    %c0_i32_0 = arith.constant 0 : i32
    %c0_i32_1 = arith.constant 0 : i32
    return %arg1, %arg0, %c0_i32, %c0_i32_0 : i32, i32, i32, i32
  }
}

</mosaic_0001>

<bundles_post_ra>
// kernel: ms_ssa_conv.1
= control target key start
LH: loop header
LB: loop body
LE: loop exit
PB: predicated region body
PF: predicated region fallthrough
CT: control target
= control target key end

     0   :  { %12 = vsyncpa [#allocation6], 0  ;;  %s1785_s0 = inlined_call_operand.vmem [shape: f32[4,2,32,64], index: 0, kind: input, shape index: {}]   ;;  %s1786_s1 = inlined_call_operand.vmem [shape: bf16[96,32], index: 1, kind: input, shape index: {}]   ;;  %s1787_s2 = inlined_call_operand.vmem [shape: f32[96,1], index: 2, kind: input, shape index: {}]   ;;  %s1788_s3 = inlined_call_operand.vmem [shape: bf16[32,32], index: 3, kind: input, shape index: {}]   ;;  %s1789_s4 = inlined_call_operand.vmem [shape: f32[32,1], index: 4, kind: input, shape index: {}]   ;;  %s1790_s5 = inlined_call_operand.vmem [shape: f32[4,2,32,64], index: 5, kind: output, shape index: {0}]   ;;  %s1791_s6 = inlined_call_operand.hbm [shape: bf16[4,2,32,64], index: 6, kind: output, shape index: {1}]  }
   0x1   :  { %14 = vsyncpa [#allocation6 + $0x1], 0  ;;  %s1410_s21 = smov 0   ;;  %s1412_s22 = smov 0  }
   0x2   :  { %s1414_s23 = smov 0   ;;  %s1416_s24 = smov 0  }
   0x3   :  { %s1418_s25 = smov 0   ;;  %s1420_s26 = smov 0  }
   0x4   :  { %s1422_s27 = smov 0   ;;  %s1424_s28 = smov 0  }
   0x5 LB: > { %1796 = sst [smem:[#allocation8_spill]] %s1358_s26  ;;  %s1068_s29 = sadd.s32 4294967295, %s1366_s28   ;;  %s1366_s28 = sphi %s1424_s28, %s20_s28   ;;  %s1362_s27 = sphi %s1422_s27, %s1809_s27   ;;  %s1358_s26 = sphi %s1420_s26, %s1808_s26   ;;  %s1354_s25 = sphi %s1418_s25, %s1807_s25   ;;  %s1350_s24 = sphi %s1416_s24, %s1806_s24   ;;  %s1346_s23 = sphi %s1414_s23, %s1812_s23   ;;  %s1342_s22 = sphi %s1412_s22, %s1811_s22   ;;  %s1338_s21 = sphi %s1410_s21, %s1810_s21  }
   0x6   : > { %1797 = sst [smem:[#allocation9_spill]] %s1362_s27  ;;  %s1069_s30 = sadd.s32 4294967294, %s1366_s28  }
   0x7   : > { %s29_s7 = sadd.s32 1, %s1358_s26  ;;  %s32_s8 = sadd.s32 1, %s1362_s27 }
   0x8   : > { %p30_p0 = scmp.ge.s32.totalorder %s29_s7, 4  ;;  %p191_p1 = scmp.ne.s32.totalorder %s1346_s23, %s1342_s22 }
   0x9   : > { %p192_p2 = scmp.eq.s32.totalorder %s1068_s29, 7  ;;  %p197_p5 = scmp.ne.s32.totalorder %s1342_s22, %s1338_s21 }
   0xa   : > { %s1814_s7 = smov (%p30_p0, %s29_s7), 0  ;;  %s1816_s8 = smov (!%p30_p0, %s32_s8), %s1362_s27 }
   0xb   : > { %1798 = sst [smem:[#allocation10_spill]] %s1814_s7  ;;  %s176_s9 = ssub.s32 %s1358_s26, %s1814_s7 }
   0xc   : > { %p1461_p3 = por %p192_p2, %p191_p1  ;;  %p34_p4 = scmp.ge.s32.totalorder %s1816_s8, 2 }
   0xd   : > { %p198_p6 = scmp.eq.s32.totalorder %s1069_s30, 7  ;;  %p1072_p7 = scmp.ge.s32.totalorder %s1366_s28, 1 }
   0xe   : > { %s1818_s8 = smov (%p34_p4, %s1816_s8), 0  ;;  %p240_p9 = scmp.lt.s32.totalorder %s1366_s28, 9 }
   0xf   : > { %1800 = sst [smem:[#allocation11_spill]] %s1818_s8  ;;  %p1470_p8 = por %p198_p6, %p197_p5 }
  0x10   : > { %s177_s12 = ssub.s32 %s1362_s27, %s1818_s8  ;;  %s181_s13 = sadd.s32 1, %s1346_s23 }
  0x11   : > { %s178_s14 = sor.u32 %s177_s12, %s176_s9  ;;  %p241_p10 = pnand %p1072_p7, %p240_p9 }
  0x12   : > { %p179_p11 = scmp.eq.s32.totalorder %s178_s14, 0  ;;  %s280_s16 = sand.u32 (!%p241_p10), 1, %s1342_s22  }
  0x13   : > { %244 = sbr.rel (%p241_p10) target bundleno = 810 (0x32a), region = 40  ;;  %p283_p12 = scmp.lt.s32.totalorder (!%p241_p10), %s1350_s24, 3 }
  0x14   : > { %s1479_s15 = scalar_select %p179_p11, %s1346_s23, %s181_s13  }
  0x15   : > { %s1073_s17 = sshll.u32 (!%p241_p10), %s280_s16, 4  ;;  %p285_p13 = scmp.lt.s32.totalorder (!%p241_p10), %s1354_s25, 1 }
  0x16   : > { %s1498_s26 = scalar_lea.vmem (!%p241_p10), [#allocation5], %s1073_s17  ;;  %p1080_p0 = scmp.ne.s32.totalorder (!%p241_p10), %s1350_s24, 0 }
  0x1a   : > { %s284_s18 = scalar_select %p283_p12, %s1350_s24, 3 }
  0x1b   : > { %s286_s19 = scalar_select %p285_p13, %s1354_s25, 1 }
  0x1c   : > { %s1075_s20 = sshll.u32 %s284_s18, 3  ;;  %305 = sbr.rel (%p1080_p0) target bundleno = 39 (0x27), region = 44  ;;  %vm306_vm0 = vcmask (!%p1080_p0), 523264   ;;  %vm323_vm1 = vcmask (!%p1080_p0), 7168   ;;  %v1368_v0 = vmov (!%p1080_p0), 0.0  }
  0x1d   : > { %s1074_s29 = sshll.u32 %s286_s19, 2  ;;  %307 = vst.msk [vmem:[#allocation2] sm:$0xff] (!%p1080_p0), %vm306_vm0, %v1368_v0  ;;  %308 = vst.msk [vmem:[#allocation2 + $0x8] sm:$0xff] (!%p1080_p0), %vm306_vm0, %v1368_v0 }
  0x1e   : > { %s289_s30 = sadd.s32 %s1075_s20, %s1074_s29  ;;  %309 = vst.msk [vmem:[#allocation2 + $0x10] sm:$0xff] (!%p1080_p0), %vm306_vm0, %v1368_v0  ;;  %310 = vst.msk [vmem:[#allocation2 + $0x18] sm:$0xff] (!%p1080_p0), %vm306_vm0, %v1368_v0 }
  0x1f   : > { %s1076_s9 = sshll.u32 %s289_s30, 3  ;;  %311 = vst.msk [vmem:[#allocation3] sm:$0xff] (!%p1080_p0), %vm306_vm0, %v1368_v0  ;;  %312 = vst.msk [vmem:[#allocation3 + $0x8] sm:$0xff] (!%p1080_p0), %vm306_vm0, %v1368_v0 }
  0x20   : > { %s1491_s14 = scalar_lea.vmem %s1785_s0, %s1076_s9  ;;  %s1496_s27 = scalar_lea.vmem %s1790_s5, %s1076_s9  ;;  %313 = vst.msk [vmem:[#allocation3 + $0x10] sm:$0xff] (!%p1080_p0), %vm306_vm0, %v1368_v0  ;;  %314 = vst.msk [vmem:[#allocation3 + $0x18] sm:$0xff] (!%p1080_p0), %vm306_vm0, %v1368_v0 }
  0x21   : > { %315 = vst.msk [vmem:[#allocation3 + $0x20] sm:$0xff] (!%p1080_p0), %vm306_vm0, %v1368_v0  ;;  %316 = vst.msk [vmem:[#allocation3 + $0x28] sm:$0xff] (!%p1080_p0), %vm306_vm0, %v1368_v0 }
  0x22   : > { %317 = vst.msk [vmem:[#allocation3 + $0x30] sm:$0xff] (!%p1080_p0), %vm306_vm0, %v1368_v0  ;;  %318 = vst.msk [vmem:[#allocation3 + $0x38] sm:$0xff] (!%p1080_p0), %vm306_vm0, %v1368_v0 }
  0x23   : > { %319 = vst.msk [vmem:[#allocation3 + $0x40] sm:$0xff] %vm306_vm0, %v1368_v0  ;;  %320 = vst.msk [vmem:[#allocation3 + $0x48] sm:$0xff] %vm306_vm0, %v1368_v0 }
  0x24   : > { %321 = vst.msk [vmem:[#allocation3 + $0x50] sm:$0xff] %vm306_vm0, %v1368_v0  ;;  %322 = vst.msk [vmem:[#allocation3 + $0x58] sm:$0xff] %vm306_vm0, %v1368_v0 }
  0x25   : > { %324 = vst.msk [vmem:[#allocation4] sm:$0xff] %vm323_vm1, %v1368_v0  ;;  %325 = vst.msk [vmem:[#allocation4 + $0x8] sm:$0xff] %vm323_vm1, %v1368_v0 }
  0x26   : > { %326 = vst.msk [vmem:[#allocation4 + $0x10] sm:$0xff] %vm323_vm1, %v1368_v0  ;;  %327 = vst.msk [vmem:[#allocation4 + $0x18] sm:$0xff] %vm323_vm1, %v1368_v0 }
  0x27 PF: > { %v1522_v1 = vld [vmem:[%s1491_s14] sm:$0xff]  ;;  %v1525_v2 = vld [vmem:[%s1491_s14 + $0x8] sm:$0xff]  ;;  %v1529_v6 = vld [vmem:[%s1491_s14 + $0x10] sm:$0xff]  ;;  %vm497_vm2 = vcmask 261120   ;;  %v1369_v11 = vmov 0   ;;  %v1370_v24 = vmov 0.0  }
  0x28   : > { %v364_v3 = vld [vmem:[#allocation2] sm:$0xff]  ;;  %v365_v4 = vld [vmem:[#allocation2 + $0x8] sm:$0xff]  ;;  %v1532_v7 = vld [vmem:[%s1491_s14 + $0x18] sm:$0xff]  ;;  %1252 = vset.pattern.permute.xlu0 %v1369_v11  ;;  %1253 = vset.pattern.permute.xlu1 %v1369_v11  ;;  %v1371_v31 = vmov 1.0|1.0   ;;  %vm400_vm9 = vcmask 523264  }
  0x29   : > { %v368_v5 = vsub.f32 %v1522_v1, %v364_v3  ;;  %v369_v8 = vsub.f32 %v1525_v2, %v365_v4  ;;  %v366_v9 = vld [vmem:[#allocation2 + $0x10] sm:$0xff]  ;;  %v367_v10 = vld [vmem:[#allocation2 + $0x18] sm:$0xff]  ;;  %v1264_v15 = vld [vmem:[%s1786_s1] sm:$0xff]   ;;  %vm909_vm10 = vcmask 519168   ;;  %s1126_s7 = sshll.u32 %s1354_s25, 2  ;;  %s1127_s8 = sshll.u32 %s1350_s24, 3 }
  0x2a   : > { %v370_v13 = vsub.f32 %v1529_v6, %v366_v9  ;;  %v371_v14 = vsub.f32 %v1532_v7, %v367_v10  ;;  %v1265_v17 = vld [vmem:[%s1786_s1 + $0x20] sm:$0xff]   ;;  %1151 = vmatprep.mubr.msk.bf16.mxu0 %vm497_vm2, %v1264_v15  ;;  %v345_v36 = vld [vmem:[%s1787_s2 + $0x28] sm:$0xff]  ;;  %v346_v46 = vld [vmem:[%s1787_s2 + $0x30] sm:$0xff]  ;;  %s942_s17 = sshll.u32 %s1498_s26, 4  ;;  %s939_s18 = sadd.s32 %s1127_s8, %s1126_s7  ;;  %s1712_s17 = int_to_ptr.vmem [resolvable:$true] %s942_s17 }
  0x2b   : > { %v372_v12 = vmul.f32 0.5, %v368_v5  ;;  %v373_v16 = vmul.f32 0.5, %v369_v8  ;;  %1159 = vmatprep.mubr.msk.bf16.mxu1 %vm497_vm2, %v1265_v17  ;;  %v344_v26 = vld [vmem:[%s1787_s2 + $0x20] sm:$0xff]  ;;  %v1266_v43 = vld [vmem:[%s1786_s1 + $0x8] sm:$0xff]   ;;  %v1268_v47 = vld [vmem:[%s1786_s1 + $0x10] sm:$0xff]   ;;  %s1128_s19 = sshll.u32 %s939_s18, 6 }
  0x2c   : > { %v374_v19 = vmul.f32 0.5, %v370_v13  ;;  %v375_v20 = vmul.f32 0.5, %v371_v14  ;;  %429 = vperm.xlu0 %1252, %v344_v26   ;;  %v348_v35 = vld [vmem:[%s1787_s2 + $0x40] sm:$0xff]  ;;  %v1267_v44 = vld [vmem:[%s1786_s1 + $0x28] sm:$0xff]   ;;  %v347_v48 = vld [vmem:[%s1787_s2 + $0x38] sm:$0xff]  ;;  %s1717_s30 = scalar_lea.hbm %s1791_s6, %s1128_s19  ;;  %s1721_s9 = scalar_lea.sflag [#allocation6], %s280_s16 }
  0x2d   : > { %v376_v18 = vadd.f32 %v372_v12, %v364_v3  ;;  %v377_v21 = vadd.f32 %v373_v16, %v365_v4  ;;  %449 = vperm.xlu1 %1253, %v348_v35   ;;  %v349_v45 = vld [vmem:[%s1787_s2 + $0x48] sm:$0xff]  ;;  %v350_v49 = vld [vmem:[%s1787_s2 + $0x50] sm:$0xff]  ;;  %v1269_v50 = vld [vmem:[%s1786_s1 + $0x18] sm:$0xff]   ;;  %s1272_s12 = scalar_lea.vmem %s1712_s17, 256  ;;  %s1372_s24 = smov [#allocation5]  }
  0x2e   : > { %v378_v22 = vadd.f32 %v374_v19, %v366_v9  ;;  %v379_v23 = vadd.f32 %v375_v20, %v367_v10  ;;  %v351_v51 = vld [vmem:[%s1787_s2 + $0x58] sm:$0xff]  ;;  %v607_v62 = vld [vmem:[#allocation3 + $0x50] sm:$0xff]  ;;  %v605_v4 = vld [vmem:[#allocation3 + $0x40] sm:$0xff]  ;;  %p1273_p1 = scmp.ne.s32.totalorder %s1712_s17, %s1272_s12  ;;  %s1276_s25 = sshll.u32 %s1372_s24, 4  ;;  %s1277_s25 = int_to_ptr.vmem [resolvable:$false] %s1276_s25 }
  0x2f   : > { %vm380_vm3 = vcmp.ge.f32.partialorder %v376_v18, 1.0  ;;  %vm381_vm4 = vcmp.ge.f32.partialorder %v377_v21, 1.0  ;;  %v608_v10 = vld [vmem:[#allocation3 + $0x58] sm:$0xff]  ;;  %v606_v15 = vld [vmem:[#allocation3 + $0x48] sm:$0xff]  ;;  %p1279_p5 = scmp.lt.s32.totalorder %s1712_s17, %s1277_s25 }
  0x30   : > { %v1081_v25 = vsel %vm380_vm3, 1.0, %v1370_v24  ;;  %v1082_v27 = vsel %vm381_vm4, 1.0, %v1370_v24  ;;  %vm1550_vm5 = vmpackc.low %vm381_vm4, %vm380_vm3  ;;  %vm382_vm6 = vcmp.ge.f32.partialorder %v378_v22, 1.0  ;;  %vm383_vm7 = vcmp.ge.f32.partialorder %v379_v23, 1.0  ;;  %434 = vperm.xlu0 %1252, %v345_v36   ;;  %v604_v36 = vld [vmem:[#allocation3 + $0x38] sm:$0xff]  ;;  %p1274_p2 = pnand %p1273_p1, %p1461_p3 }
  0x31   : > { %v392_v28 = vsub.f32 1.0, %v1081_v25  ;;  %v393_v30 = vsub.f32 1.0, %v1082_v27  ;;  %1147 = vmatprep.subr.msk.bf16.mxu0 %vm1550_vm5, %v1371_v31  ;;  %1171 = vmatprep.subr.msk.bf16.mxu1 %vm1550_vm5, %v1371_v31  ;;  %v1083_v32 = vsel %vm382_vm6, 1.0, %v1370_v24  ;;  %v1084_v33 = vsel %vm383_vm7, 1.0, %v1370_v24  ;;  %vm1560_vm8 = vmpackc.low %vm383_vm7, %vm382_vm6 }
  0x32   : > { %1148 = vmatpush3.bf16.msk.msra.mxu0 %vm1550_vm5, %v1371_v31  ;;  %1173 = vmatpush3.bf16.msk.msra.mxu1 %vm1550_vm5, %v1371_v31  ;;  %v394_v38 = vsub.f32 1.0, %v1083_v32  ;;  %v395_v39 = vsub.f32 1.0, %v1084_v33  ;;  %v601_v32 = vld [vmem:[#allocation3 + $0x20] sm:$0xff]  ;;  %vm769_vm6 = vcmask 7168   ;;  %p1275_p4 = pneg %p1274_p2 }
  0x33   : > { %v396_v37 = vmul.f32 %v392_v28, %v376_v18  ;;  %v397_v40 = vmul.f32 %v393_v30, %v377_v21  ;;  %1149 = vmatprep.subr.msk.bf16.mxu0 %vm1560_vm8, %v1371_v31  ;;  %1172 = vmatprep.subr.msk.bf16.mxu1 %vm1560_vm8, %v1371_v31  ;;  %v603_v28 = vld [vmem:[#allocation3 + $0x30] sm:$0xff] }
  0x34   : > { %v398_v41 = vmul.f32 %v394_v38, %v378_v22  ;;  %v399_v42 = vmul.f32 %v395_v39, %v379_v23  ;;  %454 = vperm.xlu1 %1253, %v349_v45   ;;  %439 = vperm.xlu0 %1252, %v346_v46  }
  0x35   : > { %401 = vst.msk [vmem:[#allocation2] sm:$0xff] %vm400_vm9, %v396_v37  ;;  %402 = vst.msk [vmem:[#allocation2 + $0x8] sm:$0xff] %vm400_vm9, %v397_v40 }
  0x36   : > { %403 = vst.msk [vmem:[#allocation2 + $0x10] sm:$0xff] %vm400_vm9, %v398_v41  ;;  %404 = vst.msk [vmem:[#allocation2 + $0x18] sm:$0xff] %vm400_vm9, %v399_v42  ;;  %1150 = vmatpush3.bf16.msk.msra.mxu0 %vm1560_vm8, %v1371_v31  ;;  %1174 = vmatpush3.bf16.msk.msra.mxu1 %vm1560_vm8, %v1371_v31  ;;  %v602_v41 = vld [vmem:[#allocation3 + $0x28] sm:$0xff] }
  0x38   : > { %444 = vperm.xlu1 %1253, %v347_v48   ;;  %459 = vperm.xlu0 %1252, %v350_v49  }
  0x39   : > { %1152 = vmatmul.mubr.msk.bf16.vlgmr.msra.gmra.mrb[0].mxu0 %vm497_vm2, %v1266_v43  ;;  %1160 = vmatmul.mubr.msk.bf16.vlgmr.msra.gmra.mrb[0].mxu1 %vm497_vm2, %v1267_v44 }
  0x3a   : > { %1155 = vmatprep.mubr.msk.bf16.mxu0 %vm497_vm2, %v1268_v47 }
  0x3c   : > { %464 = vperm.xlu1 %1253, %v351_v51  }
  0x41   : > { %1156 = vmatmul.mubr.msk.bf16.gmra.mrb[4].mxu0 %vm497_vm2, %v1269_v50 }
  0xab   : > { %v430_v52 = vpop.permute.xlu0 %429 }
  0xac   : > { %v450_v53 = vpop.permute.xlu1 %449 }
  0xaf   : > { %v435_v54 = vpop.permute.xlu0 %434 }
  0xb3   : > { %v455_v55 = vpop.permute.xlu1 %454  ;;  %v440_v56 = vpop.permute.xlu0 %439 }
  0xb7   : > { %v445_v57 = vpop.permute.xlu1 %444  ;;  %v460_v58 = vpop.permute.xlu0 %459 }
  0xbb   : > { %v465_v59 = vpop.permute.xlu1 %464 }
 0x10c   : > { %v1617_v60 = vpop.f32.mrb[0].mxu0  ;;  %v1161_v61 = vpop.f32.mrb[0].mxu1 }
 0x10d   : > { %v591_v63 = vadd.f32 %v1161_v61, %v460_v58  ;;  %v1619_v0 = vpop.f32.mrb[1].mxu0  ;;  %v582_v3 = vpop.f32.mrb[1].mxu1 }
 0x10e   : > { %v583_v5 = vadd.f32 %v582_v3, %v450_v53  ;;  %v1621_v8 = vpop.f32.mrb[2].mxu0  ;;  %v1162_v9 = vpop.f32.mrb[2].mxu1 }
 0x10f   : > { %v619_v11 = vsub.f32 %v591_v63, %v607_v62  ;;  %v594_v12 = vadd.f32 %v1162_v9, %v465_v59  ;;  %v1623_v13 = vpop.f32.mrb[3].mxu0  ;;  %v585_v14 = vpop.f32.mrb[3].mxu1 }
 0x110   : > { %v617_v16 = vsub.f32 %v583_v5, %v605_v4  ;;  %v586_v17 = vadd.f32 %v585_v14, %v455_v55 }
 0x111   : > { %v631_v18 = vmul.f32 0.5, %v619_v11  ;;  %v620_v19 = vsub.f32 %v594_v12, %v608_v10 }
 0x112   : > { %v629_v20 = vmul.f32 0.5, %v617_v16  ;;  %v618_v21 = vsub.f32 %v586_v17, %v606_v15 }
 0x113   : > { %v643_v22 = vadd.f32 %v631_v18, %v607_v62  ;;  %v632_v23 = vmul.f32 0.5, %v620_v19 }
 0x114   : > { %v641_v25 = vadd.f32 %v629_v20, %v605_v4  ;;  %v630_v26 = vmul.f32 0.5, %v618_v21  ;;  %v1157_v27 = vpop.f32.mrb[4].mxu0 }
 0x115   : > { %v1625_v29 = vadd.f32 %v632_v23, %v608_v10  ;;  %v575_v30 = vadd.f32 %v1157_v27, %v440_v56  ;;  %v566_v31 = vpop.f32.mrb[5].mxu0  ;;  %vm655_vm11 = vcmp.ge.f32.partialorder %v643_v22, 1.0 }
 0x116   : > { %v642_v33 = vadd.f32 %v630_v26, %v606_v15  ;;  %v567_v34 = vadd.f32 %v566_v31, %v430_v52  ;;  %v1158_v35 = vpop.f32.mrb[6].mxu0  ;;  %vm653_vm12 = vcmp.ge.f32.partialorder %v641_v25, 1.0  ;;  %v1111_v37 = vsel %vm655_vm11, 1.0, %v1370_v24 }
 0x117   : > { %v615_v38 = vsub.f32 %v575_v30, %v603_v28  ;;  %v578_v39 = vadd.f32 %v1158_v35, %v445_v57  ;;  %v569_v40 = vpop.f32.mrb[7].mxu0  ;;  %v1109_v42 = vsel %vm653_vm12, 1.0, %v1370_v24  ;;  %v691_v43 = vsub.f32 1.0, %v1111_v37  ;;  %v342_v35 = vld [vmem:[%s1787_s2 + $0x10] sm:$0xff] }
 0x118   : > { %v613_v44 = vsub.f32 %v567_v34, %v601_v32  ;;  %v570_v45 = vadd.f32 %v569_v40, %v435_v54  ;;  %v689_v46 = vsub.f32 1.0, %v1109_v42  ;;  %v1131_v47 = vpack.c.bf16 %v1109_v42, %v1109_v42  ;;  %v340_v34 = vld [vmem:[%s1787_s2] sm:$0xff]  ;;  %v734_v40 = vld [vmem:[#allocation4 + $0x8] sm:$0xff] }
 0x119   : > { %v627_v48 = vmul.f32 0.5, %v615_v38  ;;  %v616_v49 = vsub.f32 %v578_v39, %v604_v36  ;;  %vm654_vm13 = vcmp.ge.f32.partialorder %v642_v33, 1.0  ;;  %v703_v50 = vmul.f32 %v691_v43, %v643_v22  ;;  %v733_v38 = vld [vmem:[#allocation4] sm:$0xff]  ;;  %v735_v43 = vld [vmem:[#allocation4 + $0x10] sm:$0xff] }
 0x11a   : > { %v625_v51 = vmul.f32 0.5, %v613_v44  ;;  %v614_v52 = vsub.f32 %v570_v45, %v602_v41  ;;  %v701_v53 = vmul.f32 %v689_v46, %v641_v25  ;;  %910 = vst.msk [vmem:[%s1498_s26] sm:$0xf] %vm909_vm10, %v1131_v47  ;;  %v1110_v55 = vsel %vm654_vm13, 1.0, %v1370_v24 }
 0x11b   : > { %v639_v56 = vadd.f32 %v627_v48, %v603_v28  ;;  %v628_v57 = vmul.f32 0.5, %v616_v49  ;;  %v690_v58 = vsub.f32 1.0, %v1110_v55  ;;  %v1132_v59 = vpack.c.bf16 %v1110_v55, %v1110_v55  ;;  %715 = vst.msk [vmem:[#allocation3 + $0x50] sm:$0xff] %vm400_vm9, %v703_v50  ;;  %v597_v50 = vld [vmem:[#allocation3] sm:$0xff] }
 0x11c   : > { %v637_v54 = vadd.f32 %v625_v51, %v601_v32  ;;  %v626_v61 = vmul.f32 0.5, %v614_v52  ;;  %713 = vst.msk [vmem:[#allocation3 + $0x40] sm:$0xff] %vm400_vm9, %v701_v53  ;;  %v1133_v62 = vpack.c.bf16 %v1111_v37, %v1111_v37  ;;  %vm656_vm14 = vcmp.ge.f32.partialorder %v1625_v29, 1.0 }
 0x11d   : > { %v640_v63 = vadd.f32 %v628_v57, %v604_v36  ;;  %v702_v3 = vmul.f32 %v690_v58, %v642_v33  ;;  %911 = vst.msk [vmem:[%s1498_s26 + $0x4] sm:$0xf] %vm909_vm10, %v1132_v59  ;;  %vm651_vm15 = vcmp.ge.f32.partialorder %v639_v56, 1.0  ;;  %v1112_v4 = vsel %vm656_vm14, 1.0, %v1370_v24  ;;  %v343_v36 = vld [vmem:[%s1787_s2 + $0x18] sm:$0xff] }
 0x11e   : > { %v638_v5 = vadd.f32 %v626_v61, %v602_v41  ;;  %vm649_vm0 = vcmp.ge.f32.partialorder %v637_v54, 1.0  ;;  %v1107_v9 = vsel %vm651_vm15, 1.0, %v1370_v24  ;;  %912 = vst.msk [vmem:[%s1498_s26 + $0x8] sm:$0xf] %vm909_vm10, %v1133_v62  ;;  %v692_v10 = vsub.f32 1.0, %v1112_v4 }
 0x11f   : > { %v1105_v11 = vsel %vm649_vm0, 1.0, %v1370_v24  ;;  %714 = vst.msk [vmem:[#allocation3 + $0x48] sm:$0xff] %vm400_vm9, %v702_v3  ;;  %v687_v12 = vsub.f32 1.0, %v1107_v9  ;;  %v719_v14 = vmul.f32 %v1111_v37, %v1107_v9  ;;  %vm652_vm1 = vcmp.ge.f32.partialorder %v640_v63, 1.0  ;;  %v341_v37 = vld [vmem:[%s1787_s2 + $0x8] sm:$0xff] }
 0x120   : > { %v717_v15 = vmul.f32 %v1109_v42, %v1105_v11  ;;  %v685_v16 = vsub.f32 1.0, %v1105_v11  ;;  %vm650_vm3 = vcmp.ge.f32.partialorder %v638_v5, 1.0  ;;  %v1108_v17 = vsel %vm652_vm1, 1.0, %v1370_v24 }
 0x121   : > { %v1106_v18 = vsel %vm650_vm3, 1.0, %v1370_v24  ;;  %v699_v19 = vmul.f32 %v687_v12, %v639_v56  ;;  %v688_v20 = vsub.f32 1.0, %v1108_v17  ;;  %v704_v27 = vmul.f32 %v692_v10, %v1625_v29  ;;  %v736_v56 = vld [vmem:[#allocation4 + $0x18] sm:$0xff]  ;;  %v599_v10 = vld [vmem:[#allocation3 + $0x10] sm:$0xff] }
 0x122   : > { %v721_v21 = vsel %vm400_vm9, %v717_v15, 0.0  ;;  %v697_v22 = vmul.f32 %v685_v16, %v637_v54  ;;  %v718_v23 = vmul.f32 %v1110_v55, %v1106_v18  ;;  %v686_v25 = vsub.f32 1.0, %v1106_v18 }
 0x123   : > { %722 = vadd.xlane.f32.xlu0 %v721_v21  ;;  %711 = vst.msk [vmem:[#allocation3 + $0x30] sm:$0xff] %vm400_vm9, %v699_v19  ;;  %v700_v26 = vmul.f32 %v688_v20, %v640_v63  ;;  %v720_v28 = vmul.f32 %v1112_v4, %v1108_v17  ;;  %v1134_v30 = vpack.c.bf16 %v1112_v4, %v1112_v4  ;;  %716 = vst.msk [vmem:[#allocation3 + $0x58] sm:$0xff] %vm400_vm9, %v704_v27  ;;  %v600_v20 = vld [vmem:[#allocation3 + $0x18] sm:$0xff] }
 0x124   : > { %709 = vst.msk [vmem:[#allocation3 + $0x20] sm:$0xff] %vm400_vm9, %v697_v22  ;;  %v724_v31 = vsel %vm400_vm9, %v718_v23, 0.0  ;;  %v698_v32 = vmul.f32 %v686_v25, %v638_v5  ;;  %v727_v33 = vsel %vm400_vm9, %v719_v14, 0.0 }
 0x125   : > { %725 = vadd.xlane.f32.xlu1 %v724_v31  ;;  %712 = vst.msk [vmem:[#allocation3 + $0x38] sm:$0xff] %vm400_vm9, %v700_v26  ;;  %v730_v29 = vsel %vm400_vm9, %v720_v28, 0.0  ;;  %v598_v26 = vld [vmem:[#allocation3 + $0x8] sm:$0xff] }
 0x126   : > { %913 = vst.msk [vmem:[%s1498_s26 + $0xc] sm:$0xf] %vm909_vm10, %v1134_v30  ;;  %s1278_s26 = scalar_lea.vmem %s1277_s25, 512 }
 0x127   : > { %710 = vst.msk [vmem:[#allocation3 + $0x28] sm:$0xff] %vm400_vm9, %v698_v32  ;;  %728 = vadd.xlane.f32.xlu0 %v727_v33  ;;  %p1280_p6 = scmp.lt.s32.totalorder %s1278_s26, %s1272_s12 }
 0x129   : > { %p1281_p7 = por %p1280_p6, %p1279_p5 }
 0x12b   : > { %731 = vadd.xlane.f32.xlu0 %v730_v29  ;;  %p1282_p9 = pnand %p1281_p7, %p1275_p4 }
 0x136   : > { %409 = vperm.xlu1 %1253, %v340_v34  }
 0x13a   : > { %419 = vperm.xlu1 %1253, %v342_v35  }
 0x13e   : > { %424 = vperm.xlu1 %1253, %v343_v36  }
 0x141   : > { %414 = vperm.xlu0 %1252, %v341_v37   ;;  %v358_v37 = vld [vmem:[%s1789_s4 + $0x10] sm:$0xff] }
 0x1b0   : > { %v723_v39 = vpop.xlane.xlu0 %722 }
 0x1b1   : > { %v737_v41 = vsub.f32 %v723_v39, %v733_v38 }
 0x1b2   : > { %v726_v42 = vpop.xlane.xlu1 %725 }
 0x1b3   : > { %v741_v44 = vmul.f32 0.5, %v737_v41  ;;  %v738_v45 = vsub.f32 %v726_v42, %v734_v40 }
 0x1b4   : > { %v729_v46 = vpop.xlane.xlu0 %728 }
 0x1b5   : > { %v745_v47 = vadd.f32 %v741_v44, %v733_v38  ;;  %v742_v48 = vmul.f32 0.5, %v738_v45  ;;  %v739_v49 = vsub.f32 %v729_v46, %v735_v43 }
 0x1b6   : > { %v410_v51 = vpop.permute.xlu1 %409 }
 0x1b7   : > { %vm749_vm4 = vcmp.ge.f32.partialorder %v745_v47, 0.5  ;;  %v746_v52 = vadd.f32 %v742_v48, %v734_v40  ;;  %v743_v53 = vmul.f32 0.5, %v739_v49  ;;  %v551_v55 = vadd.f32 %v1619_v0, %v410_v51 }
 0x1b8   : > { %v1113_v57 = vsel %vm749_vm4, 1.0, %v1370_v24  ;;  %v732_v58 = vpop.xlane.xlu0 %731 }
 0x1b9   : > { %v761_v59 = vsub.f32 1.0, %v1113_v57  ;;  %vm750_vm5 = vcmp.ge.f32.partialorder %v746_v52, 0.5  ;;  %v747_v54 = vadd.f32 %v743_v53, %v735_v43  ;;  %v609_v61 = vsub.f32 %v551_v55, %v597_v50 }
 0x1ba   : > { %v1114_v62 = vsel %vm750_vm5, 1.0, %v1370_v24  ;;  %v740_v63 = vsub.f32 %v732_v58, %v736_v56  ;;  %v420_v3 = vpop.permute.xlu1 %419 }
 0x1bb   : > { %v765_v4 = vmul.f32 %v761_v59, %v745_v47  ;;  %v762_v5 = vsub.f32 1.0, %v1114_v62  ;;  %vm751_vm7 = vcmp.ge.f32.partialorder %v747_v54, 0.5  ;;  %v621_v9 = vmul.f32 0.5, %v609_v61  ;;  %v359_v47 = vld [vmem:[%s1789_s4 + $0x18] sm:$0xff] }
 0x1bc   : > { %v1115_v0 = vsel %vm751_vm7, 1.0, %v1370_v24  ;;  %v744_v11 = vmul.f32 0.5, %v740_v63  ;;  %v559_v12 = vadd.f32 %v1617_v60, %v420_v3  ;;  %v1254_v14 = vpack.i.bf16 %v1114_v62, %v1113_v57  ;;  %v356_v60 = vld [vmem:[%s1789_s4] sm:$0xff] }
 0x1bd   : > { %770 = vst.msk [vmem:[#allocation4] sm:$0xff] %vm769_vm6, %v765_v4  ;;  %v766_v15 = vmul.f32 %v762_v5, %v746_v52  ;;  %v763_v16 = vsub.f32 1.0, %v1115_v0  ;;  %v633_v17 = vadd.f32 %v621_v9, %v597_v50  ;;  %v1270_v52 = vld [vmem:[%s1788_s3] sm:$0xff]   ;;  %v1271_v5 = vld [vmem:[%s1788_s3 + $0x8] sm:$0xff]  }
 0x1be   : > { %v748_v18 = vadd.f32 %v744_v11, %v736_v56  ;;  %v611_v19 = vsub.f32 %v559_v12, %v599_v10  ;;  %1255 = vperm.xlu0 %1252, %v1254_v14   ;;  %v425_v21 = vpop.permute.xlu1 %424  ;;  %1167 = vmatprep.mubr.msk.bf16.mxu1 %vm497_vm2, %v1270_v52 }
 0x1bf   : > { %771 = vst.msk [vmem:[#allocation4 + $0x8] sm:$0xff] %vm769_vm6, %v766_v15  ;;  %v767_v22 = vmul.f32 %v763_v16, %v747_v54  ;;  %v562_v23 = vadd.f32 %v1621_v8, %v425_v21  ;;  %vm645_vm8 = vcmp.ge.f32.partialorder %v633_v17, 1.0 }
 0x1c0   : > { %vm752_vm10 = vcmp.ge.f32.partialorder %v748_v18, 0.5  ;;  %v623_v25 = vmul.f32 0.5, %v611_v19  ;;  %v415_v27 = vpop.permute.xlu0 %414  ;;  %v1101_v28 = vsel %vm645_vm8, 1.0, %v1370_v24 }
 0x1c1   : > { %772 = vst.msk [vmem:[#allocation4 + $0x10] sm:$0xff] %vm769_vm6, %v767_v22  ;;  %v1116_v30 = vsel %vm752_vm10, 1.0, %v1370_v24  ;;  %v612_v31 = vsub.f32 %v562_v23, %v600_v20  ;;  %v554_v32 = vadd.f32 %v1623_v13, %v415_v27  ;;  %v681_v33 = vsub.f32 1.0, %v1101_v28  ;;  %v357_v13 = vld [vmem:[%s1789_s4 + $0x8] sm:$0xff] }
 0x1c2   : > { %v764_v8 = vsub.f32 1.0, %v1116_v30  ;;  %v635_v29 = vadd.f32 %v623_v25, %v599_v10  ;;  %802 = vperm.xlu0 %1252, %v356_v60   ;;  %v1259_v34 = vpack.i.bf16 %v1116_v30, %v1115_v0 }
 0x1c3   : > { %v624_v35 = vmul.f32 0.5, %v612_v31  ;;  %v610_v36 = vsub.f32 %v554_v32, %v598_v26  ;;  %v693_v38 = vmul.f32 %v681_v33, %v633_v17 }
 0x1c4   : > { %v768_v39 = vmul.f32 %v764_v8, %v748_v18  ;;  %1260 = vperm.xlu1 %1253, %v1259_v34   ;;  %vm647_vm11 = vcmp.ge.f32.partialorder %v635_v29, 1.0 }
 0x1c5   : > { %v636_v40 = vadd.f32 %v624_v35, %v600_v20  ;;  %v622_v41 = vmul.f32 0.5, %v610_v36  ;;  %705 = vst.msk [vmem:[#allocation3] sm:$0xff] %vm400_vm9, %v693_v38  ;;  %v1103_v42 = vsel %vm647_vm11, 1.0, %v1370_v24 }
 0x1c6   : > { %773 = vst.msk [vmem:[#allocation4 + $0x18] sm:$0xff] %vm769_vm6, %v768_v39  ;;  %812 = vperm.xlu0 %1252, %v358_v37   ;;  %v683_v43 = vsub.f32 1.0, %v1103_v42 }
 0x1c7   : > { %v634_v44 = vadd.f32 %v622_v41, %v598_v26  ;;  %vm648_vm12 = vcmp.ge.f32.partialorder %v636_v40, 1.0 }
 0x1c8   : > { %807 = vperm.xlu1 %1253, %v357_v13   ;;  %v1104_v45 = vsel %vm648_vm12, 1.0, %v1370_v24  ;;  %v695_v46 = vmul.f32 %v683_v43, %v635_v29 }
 0x1c9   : > { %vm646_vm13 = vcmp.ge.f32.partialorder %v634_v44, 1.0  ;;  %v684_v48 = vsub.f32 1.0, %v1104_v45 }
 0x1ca   : > { %v1102_v49 = vsel %vm646_vm13, 1.0, %v1370_v24  ;;  %707 = vst.msk [vmem:[#allocation3 + $0x10] sm:$0xff] %vm400_vm9, %v695_v46 }
 0x1cb   : > { %v682_v50 = vsub.f32 1.0, %v1102_v49  ;;  %v696_v51 = vmul.f32 %v684_v48, %v636_v40 }
 0x1cc   : > { %817 = vperm.xlu1 %1253, %v359_v47  }
 0x1cd   : > { %v694_v53 = vmul.f32 %v682_v50, %v634_v44  ;;  %708 = vst.msk [vmem:[#allocation3 + $0x18] sm:$0xff] %vm400_vm9, %v696_v51 }
 0x1cf   : > { %706 = vst.msk [vmem:[#allocation3 + $0x8] sm:$0xff] %vm400_vm9, %v694_v53 }
 0x23d   : > { %v1256_v55 = vpop.permute.xlu0 %1255 }
 0x23e   : > { %v1258_v56 = vunpack.i.h.bf16 %v1256_v55  ;;  %v1257_v57 = vunpack.i.l.bf16 %v1256_v55 }
 0x240   : > { %v795_v24 = vmul.f32 %v1258_v56, %v1102_v49  ;;  %v794_v58 = vmul.f32 %v1257_v57, %v1101_v28 }
 0x242   : > { %v798_v59 = vpack.c.bf16 %v795_v24, %v794_v58 }
 0x243   : > { %v1261_v54 = vpop.permute.xlu1 %1260 }
 0x244   : > { %v1263_v61 = vunpack.i.h.bf16 %v1261_v54  ;;  %v1262_v62 = vunpack.i.l.bf16 %v1261_v54  ;;  %1163 = vmatprep.subr.bf16.mxu1 %v798_v59 }
 0x245   : > { %1164 = vmatpush3.bf16.msra.mxu1 %v798_v59 }
 0x246   : > { %v797_v63 = vmul.f32 %v1263_v61, %v1104_v45  ;;  %v796_v3 = vmul.f32 %v1262_v62, %v1103_v42 }
 0x248   : > { %v799_v4 = vpack.c.bf16 %v797_v63, %v796_v3 }
 0x24a   : > { %1165 = vmatprep.subr.bf16.mxu1 %v799_v4 }
 0x24b   : > { %1166 = vmatpush3.bf16.msra.mxu1 %v799_v4 }
 0x24e   : > { %1168 = vmatmul.mubr.msk.bf16.vlgmr.msra.gmra.mrb[4].mxu1 %vm497_vm2, %v1271_v5 }
 0x24f   : > { %1285 = shalt.err (!%p1282_p9)
}
 0x250   : > { %s1286_s16 = scalar_lea.hbm %s1717_s30, 256  ;;  %s1290_s7 = scalar_lea.hbm %s1791_s6, 2048 }
 0x251   : > { %p1287_p10 = scmp.ne.s32.totalorder %s1717_s30, %s1286_s16  ;;  %p1291_p13 = scmp.lt.u32.totalorder %s1717_s30, %s1791_s6 }
 0x252   : > { %p1292_p0 = scmp.lt.u32.totalorder %s1290_s7, %s1286_s16  ;;  %p1294_p2 = scmp.lt.u32.totalorder %s1286_s16, %s1717_s30 }
 0x253   : > { %p1288_p11 = pnand %p1287_p10, %p1461_p3 }
 0x254   : > { %p1293_p1 = por %p1292_p0, %p1291_p13 }
 0x255   : > { %p1289_p12 = pneg %p1288_p11 }
 0x256   : > { %p1295_p4 = por %p1294_p2, %p1293_p1 }
 0x258   : > { %p1296_p5 = pnand %p1295_p4, %p1289_p12 }
 0x25a   : > { %1299 = shalt.err (!%p1296_p5)
}
 0x25b   : > { %s1373_s19 = smov 64   ;;  %s1374_s20 = smov 4   ;;  %v803_v9 = vpop.permute.xlu0 %802  ;;  %v808_v10 = vpop.permute.xlu1 %807 }
 0x25c   : > { %1175 = dma.vmem_to_hbm [thread:$0]  (%p1461_p3), %s1712_s17, 256, %s1717_s30, %s1721_s9, %s1373_s19, %s1373_s19, %s1374_s20  }
 0x25f   : > { %v813_v0 = vpop.permute.xlu0 %812  ;;  %v818_v15 = vpop.permute.xlu1 %817 }
 0x321   : > { %v1169_v11 = vpop.f32.mrb[4].mxu1 }
 0x322   : > { %v879_v12 = vadd.f32 %v1169_v11, %v813_v0  ;;  %v870_v14 = vpop.f32.mrb[5].mxu1 }
 0x323   : > { %v871_v16 = vadd.f32 %v870_v14, %v803_v9  ;;  %v1170_v17 = vpop.f32.mrb[6].mxu1 }
 0x324   : > { %v887_v18 = vadd.f32 %v879_v12, %v1529_v6  ;;  %v882_v19 = vadd.f32 %v1170_v17, %v818_v15  ;;  %v873_v20 = vpop.f32.mrb[7].mxu1 }
 0x325   : > { %v885_v21 = vadd.f32 %v871_v16, %v1522_v1  ;;  %v874_v22 = vadd.f32 %v873_v20, %v808_v10 }
 0x326   : > { %891 = vst.msk [vmem:[%s1496_s27 + $0x10] sm:$0xff] %vm400_vm9, %v887_v18  ;;  %v888_v23 = vadd.f32 %v882_v19, %v1532_v7 }
 0x327   : > { %889 = vst.msk [vmem:[%s1496_s27] sm:$0xff] %vm400_vm9, %v885_v21  ;;  %v886_v60 = vadd.f32 %v874_v22, %v1525_v2 }
 0x328   : > { %892 = vst.msk [vmem:[%s1496_s27 + $0x18] sm:$0xff] %vm400_vm9, %v888_v23 }
 0x329   : > { %890 = vst.msk [vmem:[%s1496_s27 + $0x8] sm:$0xff] %vm400_vm9, %v886_v60 }
 0x32a PF: > { %p1181_p3 = scmp.ge.s32.totalorder %s1366_s28, 2  ;;  %s969_s10 = sand.u32 1, %s1338_s21  }
 0x32b   : > { %s970_s17 = scalar_lea.sflag [#allocation6], %s969_s10 }
 0x32c   : > { %p1178_p6 = pnand %p1181_p3, %p1470_p8 }
 0x32e   : > { %1333 = dma.done.wait (!%p1178_p6), %s970_s17, 256  }
 0x32f   : > { %1335 = vsyncadd (!%p1178_p6), %s970_s17, 4294967040  ;;  %s20_s28 = sadd.s32 1, %s1366_s28   ;;  %s1806_s24 = sld [smem:[#allocation8_spill]] }
 0x330   : > { %p17_p7 = scmp.ge.s32.totalorder %s20_s28, 10   ;;  %s1807_s25 = sld [smem:[#allocation9_spill]] }
 0x331   : > { %s1808_s26 = sld [smem:[#allocation10_spill]]  ;;  %s1809_s27 = sld [smem:[#allocation11_spill]] }
 0x332   : > { %s1810_s21 = smov %s1342_s22  ;;  %s1811_s22 = smov %s1346_s23 }
 0x333   : > { %s1812_s23 = smov %s1479_s15  ;;  %19 = sbr.rel (!%p17_p7) target bundleno = 5 (0x5), region = 91 }
 0x33a   :  { %975 = vsyncpa [#allocation6], 1 }
 0x33b   :  { %977 = vsyncpa [#allocation6 + $0x1], 1 }

</bundles_post_ra>
